<compile_context>
chip_gen: v7x
topology: tpu7x:2x2x1
jax: 0.10.0
libtpu: 0.0.40
codegen_flags: <defaults>
</compile_context>

<pallas_src>
import functools

import jax
import jax.numpy as jnp
from jax import lax
from jax.experimental import pallas as pl
from jax.experimental.pallas import tpu as pltpu


# ---------------------------------------------------------------------------
# Kernel 1: fused LayerNorm + QKV projection (runs ONCE per (batch, token tile))
# ---------------------------------------------------------------------------
def _ln_qkv_proj_kernel(x_ref, gamma_ref, beta_ref, wq_ref, wk_ref, wv_ref,
                        q_ref, k_ref, v_ref, *, heads, eps, scale):
    x = x_ref[0].astype(jnp.float32)          # (tn, D)
    gamma = gamma_ref[0]                      # (D,)
    beta = beta_ref[0]                        # (D,)

    # LayerNorm in f32 (biased variance, torch-style eps).
    mean = jnp.mean(x, axis=-1, keepdims=True)
    var = jnp.mean((x - mean) ** 2, axis=-1, keepdims=True)
    xn = ((x - mean) * lax.rsqrt(var + eps) * gamma + beta).astype(jnp.bfloat16)

    # Per-head projections: full contraction depth D, leading-axis weight indexing
    # (no sub-128 lane slices of a wide weight slab).  Static small loop over heads.
    for h in range(heads):
        q_h = jnp.dot(xn, wq_ref[h], preferred_element_type=jnp.float32)
        k_h = jnp.dot(xn, wk_ref[h], preferred_element_type=jnp.float32)
        v_h = jnp.dot(xn, wv_ref[h], preferred_element_type=jnp.float32)
        q_ref[0, h] = (q_h * scale).astype(jnp.bfloat16)   # fold 1/sqrt(Dh) into Q
        k_ref[0, h] = k_h.astype(jnp.bfloat16)
        v_ref[0, h] = v_h.astype(jnp.bfloat16)


# ---------------------------------------------------------------------------
# Kernel 2: flash attention (online softmax) + fused output projection
# ---------------------------------------------------------------------------
def _flash_attention_kernel(q_ref, k_ref, v_ref, wout_ref, o_ref,
                            acc_scr, m_scr, l_scr, *, heads):
    ki = pl.program_id(2)
    nk = pl.num_programs(2)

    # ---- init accumulators once per (batch, q-tile) ----
    @pl.when(ki == 0)
    def _():
        acc_scr[...] = jnp.zeros_like(acc_scr)
        m_scr[...] = jnp.full_like(m_scr, -jnp.inf)
        l_scr[...] = jnp.zeros_like(l_scr)

    q = q_ref[0]          # (H, tq, Dh) bf16, pre-scaled by 1/sqrt(Dh)
    k = k_ref[0]          # (H, tk, Dh) bf16
    v = v_ref[0]          # (H, tk, Dh) bf16

    # Head-batched QK^T (no transposes, no lane slices).
    s = jnp.einsum('hqd,hkd->hqk', q, k,
                   preferred_element_type=jnp.float32)      # (H, tq, tk) f32

    m_prev = m_scr[...]                                     # (H, tq, 1)
    m_cur = jnp.maximum(m_prev, jnp.max(s, axis=-1, keepdims=True))
    alpha = jnp.exp(m_prev - m_cur)                         # (H, tq, 1)
    p = jnp.exp(s - m_cur)                                  # (H, tq, tk) f32

    l_scr[...] = alpha * l_scr[...] + jnp.sum(p, axis=-1, keepdims=True)
    acc_scr[...] = alpha * acc_scr[...] + jnp.einsum(
        'hqk,hkd->hqd', p.astype(jnp.bfloat16), v,
        preferred_element_type=jnp.float32)
    m_scr[...] = m_cur

    # ---- finalize: exact normalization + fused output projection ----
    @pl.when(ki == nk - 1)
    def _():
        o_norm = (acc_scr[...] / l_scr[...]).astype(jnp.bfloat16)   # (H, tq, Dh)
        out = jnp.zeros(o_ref.shape[1:], jnp.float32)               # (tq, D)
        for h in range(heads):
            out = out + jnp.dot(o_norm[h], wout_ref[h],
                                preferred_element_type=jnp.float32)
        o_ref[0] = out.astype(o_ref.dtype)


# ---------------------------------------------------------------------------
# Wrapper
# ---------------------------------------------------------------------------
def _device_defaults():
    """Generation-dependent (q_tile, kv_tile, vmem_limit_bytes)."""
    kind = ""
    try:
        kind = jax.devices()[0].device_kind.lower()
    except Exception:
        pass
    if "v7" in kind or "7x" in kind:
        # 64 MiB physical VMEM per TensorCore: tighter tiles / scoped budget.
        return 256, 128, 48 * 1024 * 1024
    if "v5" in kind or "v6" in kind:
        # 128 MiB physical VMEM: larger q tiles, raised scoped-VMEM limit.
        return 256, 128, 64 * 1024 * 1024
    # Unknown device: conservative defaults.
    return 128, 128, 32 * 1024 * 1024


def attention_forward(x, gamma, beta, w_qkv, w_out, *, heads, dim_head,
                      q_tile=None, kv_tile=None):
    """x: (B, N, D) float32; returns (B, N, D) float32."""
    b, n, d = x.shape
    inner = heads * dim_head
    assert w_qkv.shape == (d, 3 * inner)
    assert w_out.shape == (inner, d)

    dq, dk, vmem_limit = _device_defaults()
    q_tile = dq if q_tile is None else q_tile
    kv_tile = dk if kv_tile is None else kv_tile
    tq = min(q_tile, n)
    tk = min(kv_tile, n)
    assert n % tq == 0 and n % tk == 0, "N must be divisible by the tile sizes"

    # Host-side weight prep (done once): split qkv, bf16, head-major slabs.
    w_qkv_b = w_qkv.astype(jnp.bfloat16)
    wq = w_qkv_b[:, 0 * inner:1 * inner].reshape(d, heads, dim_head).transpose(1, 0, 2)
    wk = w_qkv_b[:, 1 * inner:2 * inner].reshape(d, heads, dim_head).transpose(1, 0, 2)
    wv = w_qkv_b[:, 2 * inner:3 * inner].reshape(d, heads, dim_head).transpose(1, 0, 2)
    wo = w_out.astype(jnp.bfloat16).reshape(heads, dim_head, d)
    gamma2 = gamma.reshape(1, d).astype(jnp.float32)
    beta2 = beta.reshape(1, d).astype(jnp.float32)
    scale = dim_head ** (-0.5)

    # ---------------- Kernel 1: LayerNorm + QKV projection ----------------
    proj_kernel = functools.partial(_ln_qkv_proj_kernel, heads=heads,
                                    eps=1e-5, scale=scale)
    qkv_shape = jax.ShapeDtypeStruct((b, heads, n, dim_head), jnp.bfloat16)
    qkv_spec = pl.BlockSpec((1, heads, tq, dim_head), lambda bi, ti: (bi, 0, ti, 0))
    w_head_spec = pl.BlockSpec((heads, d, dim_head), lambda bi, ti: (0, 0, 0))

    q, k, v = pl.pallas_call(
        proj_kernel,
        out_shape=(qkv_shape, qkv_shape, qkv_shape),
        grid_spec=pltpu.PrefetchScalarGridSpec(
            num_scalar_prefetch=0,
            grid=(b, n // tq),
            in_specs=[
                pl.BlockSpec((1, tq, d), lambda bi, ti: (bi, ti, 0)),   # x tile
                pl.BlockSpec((1, d), lambda bi, ti: (0, 0)),            # gamma
                pl.BlockSpec((1, d), lambda bi, ti: (0, 0)),            # beta
                w_head_spec,                                            # w_q (H,D,Dh)
                w_head_spec,                                            # w_k
                w_head_spec,                                            # w_v
            ],
            out_specs=[qkv_spec, qkv_spec, qkv_spec],
        ),
        compiler_params=pltpu.CompilerParams(
            dimension_semantics=("parallel", "parallel"),
            vmem_limit_bytes=vmem_limit,
        ),
    )(x, gamma2, beta2, wq, wk, wv)

    # ------------- Kernel 2: flash attention + output projection ----------
    flash_kernel = functools.partial(_flash_attention_kernel, heads=heads)
    out = pl.pallas_call(
        flash_kernel,
        out_shape=jax.ShapeDtypeStruct((b, n, d), jnp.float32),
        grid_spec=pltpu.PrefetchScalarGridSpec(
            num_scalar_prefetch=0,
            grid=(b, n // tq, n // tk),          # KV axis MUST stay innermost.
            in_specs=[
                pl.BlockSpec((1, heads, tq, dim_head),
                             lambda bi, qi, ki: (bi, 0, qi, 0)),        # Q (pre-scaled)
                pl.BlockSpec((1, heads, tk, dim_head),
                             lambda bi, qi, ki: (bi, 0, ki, 0)),        # K
                pl.BlockSpec((1, heads, tk, dim_head),
                             lambda bi, qi, ki: (bi, 0, ki, 0)),        # V
                pl.BlockSpec((heads, dim_head, d),
                             lambda bi, qi, ki: (0, 0, 0)),             # w_out (H,Dh,D)
            ],
            out_specs=pl.BlockSpec((1, tq, d), lambda bi, qi, ki: (bi, qi, 0)),
            scratch_shapes=[
                pltpu.VMEM((heads, tq, dim_head), jnp.float32),  # head-major accumulator
                pltpu.VMEM((heads, tq, 1), jnp.float32),         # running max
                pltpu.VMEM((heads, tq, 1), jnp.float32),         # running denominator
            ],
        ),
        compiler_params=pltpu.CompilerParams(
            dimension_semantics=("parallel", "parallel", "arbitrary"),
            vmem_limit_bytes=vmem_limit,
        ),
    )(q, k, v, wo)
    return out


# ---------------------------------------------------------------------------
# Pure-JAX f32 reference mirroring the PyTorch module, for validation
# ---------------------------------------------------------------------------
def attention_reference(x, gamma, beta, w_qkv, w_out, *, heads, dim_head):
    b, n, d = x.shape
    inner = heads * dim_head
    scale = dim_head ** (-0.5)
    mean = jnp.mean(x, axis=-1, keepdims=True)
    var = jnp.mean((x - mean) ** 2, axis=-1, keepdims=True)
    xn = (x - mean) / jnp.sqrt(var + 1e-5) * gamma + beta
    qkv = xn @ w_qkv
    q, k, v = jnp.split(qkv, 3, axis=-1)

    def to_heads(t):
        return t.reshape(b, n, heads, dim_head).transpose(0, 2, 1, 3)

    q, k, v = map(to_heads, (q, k, v))
    dots = jnp.einsum('bhnd,bhmd->bhnm', q, k) * scale
    attn = jax.nn.softmax(dots, axis=-1)
    out = jnp.einsum('bhnm,bhmd->bhnd', attn, v)
    out = out.transpose(0, 2, 1, 3).reshape(b, n, inner)
    return out @ w_out


def _run_and_check(key, b, n, dim, heads, dim_head):
    inner = heads * dim_head
    kx, kq, ko = jax.random.split(key, 3)
    x = jax.random.normal(kx, (b, n, dim), dtype=jnp.float32)
    w_qkv = jax.random.normal(kq, (dim, 3 * inner), dtype=jnp.float32) * 0.05
    w_out = jax.random.normal(ko, (inner, dim), dtype=jnp.float32) * 0.05
    gamma = jnp.ones((dim,), dtype=jnp.float32)       # LayerNorm weight init
    beta = jnp.zeros((dim,), dtype=jnp.float32)       # LayerNorm bias init

    out = attention_forward(x, gamma, beta, w_qkv, w_out,
                            heads=heads, dim_head=dim_head)
    out = jax.block_until_ready(out)

    ref = attention_reference(x, gamma, beta, w_qkv, w_out,
                              heads=heads, dim_head=dim_head)
    assert out.shape == (b, n, dim)
    # bf16 MXU inputs / bf16 Q-K-V round trip -> loose-but-safe tolerance.
    assert jnp.allclose(out, ref, atol=2e-2, rtol=2e-2), (
        f"mismatch vs JAX reference (max abs diff {jnp.max(jnp.abs(out - ref))})")


if __name__ == "__main__":
    key = jax.random.PRNGKey(0)
    k1, k2 = jax.random.split(key)

    # Small shape consistent with the module (single Q/KV tile).
    _run_and_check(k1, b=2, n=8, dim=32, heads=4, dim_head=16)
    # Longer sequence: exercises the tiled flash path (multiple KV tiles).
    _run_and_check(k2, b=2, n=256, dim=32, heads=4, dim_head=16)

    print("KERNEL_OK")
</pallas_src>

<mosaic_0001>
module attributes {stable_mosaic.version = 11 : i64} {
  func.func @_ln_qkv_proj_kernel(%arg0: i32, %arg1: i32, %arg2: memref<1x8x32xf32, #tpu.memory_space<vmem>>, %arg3: memref<1x32xf32, #tpu.memory_space<vmem>>, %arg4: memref<1x32xf32, #tpu.memory_space<vmem>>, %arg5: memref<4x32x16xbf16, #tpu.memory_space<vmem>>, %arg6: memref<4x32x16xbf16, #tpu.memory_space<vmem>>, %arg7: memref<4x32x16xbf16, #tpu.memory_space<vmem>>, %arg8: memref<1x4x8x16xbf16, #tpu.memory_space<vmem>>, %arg9: memref<1x4x8x16xbf16, #tpu.memory_space<vmem>>, %arg10: memref<1x4x8x16xbf16, #tpu.memory_space<vmem>>) attributes {dimension_semantics = [#tpu.dimension_semantics<parallel>, #tpu.dimension_semantics<parallel>], iteration_bounds = array<i64: 2, 1>, scalar_prefetch = 0 : i64, scratch_operands = 0 : i64, tpu.core_type = #tpu.core_type<tc>, window_params = [{transform_indices = @transform_0, window_bounds = array<i64: 1, 8, 32>}, {pipeline_mode = #tpu.pipeline_mode<synchronous>, transform_indices = @transform_1, window_bounds = array<i64: 1, 32>}, {pipeline_mode = #tpu.pipeline_mode<synchronous>, transform_indices = @transform_2, window_bounds = array<i64: 1, 32>}, {pipeline_mode = #tpu.pipeline_mode<synchronous>, transform_indices = @transform_3, window_bounds = array<i64: 4, 32, 16>}, {pipeline_mode = #tpu.pipeline_mode<synchronous>, transform_indices = @transform_4, window_bounds = array<i64: 4, 32, 16>}, {pipeline_mode = #tpu.pipeline_mode<synchronous>, transform_indices = @transform_5, window_bounds = array<i64: 4, 32, 16>}, {transform_indices = @transform_6, window_bounds = array<i64: 1, 4, 8, 16>}, {transform_indices = @transform_7, window_bounds = array<i64: 1, 4, 8, 16>}, {transform_indices = @transform_8, window_bounds = array<i64: 1, 4, 8, 16>}]} {
    %c0 = arith.constant 0 : index
    %c0_0 = arith.constant 0 : index
    %c0_1 = arith.constant 0 : index
    %0 = vector.load %arg2[%c0, %c0_0, %c0_1] : memref<1x8x32xf32, #tpu.memory_space<vmem>>, vector<1x8x32xf32>
    %1 = vector.shape_cast %0 : vector<1x8x32xf32> to vector<8x32xf32>
    %c0_2 = arith.constant 0 : index
    %c0_3 = arith.constant 0 : index
    %2 = vector.load %arg3[%c0_2, %c0_3] : memref<1x32xf32, #tpu.memory_space<vmem>>, vector<1x32xf32>
    %3 = vector.shape_cast %2 : vector<1x32xf32> to vector<32xf32>
    %c0_4 = arith.constant 0 : index
    %c0_5 = arith.constant 0 : index
    %4 = vector.load %arg4[%c0_4, %c0_5] : memref<1x32xf32, #tpu.memory_space<vmem>>, vector<1x32xf32>
    %5 = vector.shape_cast %4 : vector<1x32xf32> to vector<32xf32>
    %cst = arith.constant dense<0.000000e+00> : vector<8xf32>
    %6 = vector.multi_reduction <add>, %1, %cst [1] : vector<8x32xf32> to vector<8xf32>
    %7 = vector.shape_cast %6 : vector<8xf32> to vector<8x1xf32>
    %cst_6 = arith.constant 3.200000e+01 : f32
    %8 = vector.broadcast %cst_6 : f32 to vector<8x1xf32>
    %9 = arith.divf %7, %8 : vector<8x1xf32>
    %10 = vector.broadcast %9 : vector<8x1xf32> to vector<8x32xf32>
    %11 = arith.subf %1, %10 : vector<8x32xf32>
    %12 = arith.mulf %11, %11 : vector<8x32xf32>
    %cst_7 = arith.constant dense<0.000000e+00> : vector<8xf32>
    %13 = vector.multi_reduction <add>, %12, %cst_7 [1] : vector<8x32xf32> to vector<8xf32>
    %14 = vector.shape_cast %13 : vector<8xf32> to vector<8x1xf32>
    %cst_8 = arith.constant 3.200000e+01 : f32
    %15 = vector.broadcast %cst_8 : f32 to vector<8x1xf32>
    %16 = arith.divf %14, %15 : vector<8x1xf32>
    %17 = vector.broadcast %9 : vector<8x1xf32> to vector<8x32xf32>
    %18 = arith.subf %1, %17 : vector<8x32xf32>
    %cst_9 = arith.constant 9.99999974E-6 : f32
    %19 = vector.broadcast %cst_9 : f32 to vector<8x1xf32>
    %20 = arith.addf %16, %19 : vector<8x1xf32>
    %21 = math.rsqrt %20 : vector<8x1xf32>
    %22 = vector.broadcast %21 : vector<8x1xf32> to vector<8x32xf32>
    %23 = arith.mulf %18, %22 : vector<8x32xf32>
    %24 = vector.shape_cast %3 : vector<32xf32> to vector<1x32xf32>
    %25 = vector.broadcast %24 : vector<1x32xf32> to vector<8x32xf32>
    %26 = arith.mulf %23, %25 : vector<8x32xf32>
    %27 = vector.shape_cast %5 : vector<32xf32> to vector<1x32xf32>
    %28 = vector.broadcast %27 : vector<1x32xf32> to vector<8x32xf32>
    %29 = arith.addf %26, %28 : vector<8x32xf32>
    %30 = arith.truncf %29 : vector<8x32xf32> to vector<8x32xbf16>
    %c0_10 = arith.constant 0 : index
    %c0_11 = arith.constant 0 : index
    %c0_12 = arith.constant 0 : index
    %31 = vector.load %arg5[%c0_10, %c0_11, %c0_12] : memref<4x32x16xbf16, #tpu.memory_space<vmem>>, vector<1x32x16xbf16>
    %32 = vector.shape_cast %31 : vector<1x32x16xbf16> to vector<32x16xbf16>
    %cst_13 = arith.constant dense<0.000000e+00> : vector<8x16xf32>
    %33 = tpu.matmul %30, %32, %cst_13 {dimension_numbers = #tpu.dot_dimension_numbers<[1], [0], [0], [1], [0, 0, 1, 1], [], []>} : vector<8x32xbf16>, vector<32x16xbf16>, vector<8x16xf32> -> vector<8x16xf32>
    %c0_14 = arith.constant 0 : index
    %c0_15 = arith.constant 0 : index
    %c0_16 = arith.constant 0 : index
    %34 = vector.load %arg6[%c0_14, %c0_15, %c0_16] : memref<4x32x16xbf16, #tpu.memory_space<vmem>>, vector<1x32x16xbf16>
    %35 = vector.shape_cast %34 : vector<1x32x16xbf16> to vector<32x16xbf16>
    %cst_17 = arith.constant dense<0.000000e+00> : vector<8x16xf32>
    %36 = tpu.matmul %30, %35, %cst_17 {dimension_numbers = #tpu.dot_dimension_numbers<[1], [0], [0], [1], [0, 0, 1, 1], [], []>} : vector<8x32xbf16>, vector<32x16xbf16>, vector<8x16xf32> -> vector<8x16xf32>
    %c0_18 = arith.constant 0 : index
    %c0_19 = arith.constant 0 : index
    %c0_20 = arith.constant 0 : index
    %37 = vector.load %arg7[%c0_18, %c0_19, %c0_20] : memref<4x32x16xbf16, #tpu.memory_space<vmem>>, vector<1x32x16xbf16>
    %38 = vector.shape_cast %37 : vector<1x32x16xbf16> to vector<32x16xbf16>
    %cst_21 = arith.constant dense<0.000000e+00> : vector<8x16xf32>
    %39 = tpu.matmul %30, %38, %cst_21 {dimension_numbers = #tpu.dot_dimension_numbers<[1], [0], [0], [1], [0, 0, 1, 1], [], []>} : vector<8x32xbf16>, vector<32x16xbf16>, vector<8x16xf32> -> vector<8x16xf32>
    %cst_22 = arith.constant 2.500000e-01 : f32
    %40 = vector.broadcast %cst_22 : f32 to vector<8x16xf32>
    %41 = arith.mulf %33, %40 : vector<8x16xf32>
    %42 = arith.truncf %41 : vector<8x16xf32> to vector<8x16xbf16>
    %c0_23 = arith.constant 0 : index
    %c0_24 = arith.constant 0 : index
    %c0_25 = arith.constant 0 : index
    %c0_26 = arith.constant 0 : index
    %43 = vector.load %arg8[%c0_23, %c0_24, %c0_25, %c0_26] : memref<1x4x8x16xbf16, #tpu.memory_space<vmem>>, vector<1x1x8x16xbf16>
    %44 = vector.shape_cast %43 : vector<1x1x8x16xbf16> to vector<8x16xbf16>
    %45 = vector.shape_cast %42 : vector<8x16xbf16> to vector<1x1x8x16xbf16>
    tpu.vector_store %arg8[%c0_23, %c0_24, %c0_25, %c0_26], %45 {strides = array<i32>} : memref<1x4x8x16xbf16, #tpu.memory_space<vmem>>, vector<1x1x8x16xbf16>,
    %46 = arith.truncf %36 : vector<8x16xf32> to vector<8x16xbf16>
    %c0_27 = arith.constant 0 : index
    %c0_28 = arith.constant 0 : index
    %c0_29 = arith.constant 0 : index
    %c0_30 = arith.constant 0 : index
    %47 = vector.load %arg9[%c0_27, %c0_28, %c0_29, %c0_30] : memref<1x4x8x16xbf16, #tpu.memory_space<vmem>>, vector<1x1x8x16xbf16>
    %48 = vector.shape_cast %47 : vector<1x1x8x16xbf16> to vector<8x16xbf16>
    %49 = vector.shape_cast %46 : vector<8x16xbf16> to vector<1x1x8x16xbf16>
    tpu.vector_store %arg9[%c0_27, %c0_28, %c0_29, %c0_30], %49 {strides = array<i32>} : memref<1x4x8x16xbf16, #tpu.memory_space<vmem>>, vector<1x1x8x16xbf16>,
    %50 = arith.truncf %39 : vector<8x16xf32> to vector<8x16xbf16>
    %c0_31 = arith.constant 0 : index
    %c0_32 = arith.constant 0 : index
    %c0_33 = arith.constant 0 : index
    %c0_34 = arith.constant 0 : index
    %51 = vector.load %arg10[%c0_31, %c0_32, %c0_33, %c0_34] : memref<1x4x8x16xbf16, #tpu.memory_space<vmem>>, vector<1x1x8x16xbf16>
    %52 = vector.shape_cast %51 : vector<1x1x8x16xbf16> to vector<8x16xbf16>
    %53 = vector.shape_cast %50 : vector<8x16xbf16> to vector<1x1x8x16xbf16>
    tpu.vector_store %arg10[%c0_31, %c0_32, %c0_33, %c0_34], %53 {strides = array<i32>} : memref<1x4x8x16xbf16, #tpu.memory_space<vmem>>, vector<1x1x8x16xbf16>,
    %c1 = arith.constant 1 : index
    %c0_35 = arith.constant 0 : index
    %c0_36 = arith.constant 0 : index
    %54 = vector.load %arg5[%c1, %c0_35, %c0_36] : memref<4x32x16xbf16, #tpu.memory_space<vmem>>, vector<1x32x16xbf16>
    %55 = vector.shape_cast %54 : vector<1x32x16xbf16> to vector<32x16xbf16>
    %cst_37 = arith.constant dense<0.000000e+00> : vector<8x16xf32>
    %56 = tpu.matmul %30, %55, %cst_37 {dimension_numbers = #tpu.dot_dimension_numbers<[1], [0], [0], [1], [0, 0, 1, 1], [], []>} : vector<8x32xbf16>, vector<32x16xbf16>, vector<8x16xf32> -> vector<8x16xf32>
    %c1_38 = arith.constant 1 : index
    %c0_39 = arith.constant 0 : index
    %c0_40 = arith.constant 0 : index
    %57 = vector.load %arg6[%c1_38, %c0_39, %c0_40] : memref<4x32x16xbf16, #tpu.memory_space<vmem>>, vector<1x32x16xbf16>
    %58 = vector.shape_cast %57 : vector<1x32x16xbf16> to vector<32x16xbf16>
    %cst_41 = arith.constant dense<0.000000e+00> : vector<8x16xf32>
    %59 = tpu.matmul %30, %58, %cst_41 {dimension_numbers = #tpu.dot_dimension_numbers<[1], [0], [0], [1], [0, 0, 1, 1], [], []>} : vector<8x32xbf16>, vector<32x16xbf16>, vector<8x16xf32> -> vector<8x16xf32>
    %c1_42 = arith.constant 1 : index
    %c0_43 = arith.constant 0 : index
    %c0_44 = arith.constant 0 : index
    %60 = vector.load %arg7[%c1_42, %c0_43, %c0_44] : memref<4x32x16xbf16, #tpu.memory_space<vmem>>, vector<1x32x16xbf16>
    %61 = vector.shape_cast %60 : vector<1x32x16xbf16> to vector<32x16xbf16>
    %cst_45 = arith.constant dense<0.000000e+00> : vector<8x16xf32>
    %62 = tpu.matmul %30, %61, %cst_45 {dimension_numbers = #tpu.dot_dimension_numbers<[1], [0], [0], [1], [0, 0, 1, 1], [], []>} : vector<8x32xbf16>, vector<32x16xbf16>, vector<8x16xf32> -> vector<8x16xf32>
    %cst_46 = arith.constant 2.500000e-01 : f32
    %63 = vector.broadcast %cst_46 : f32 to vector<8x16xf32>
    %64 = arith.mulf %56, %63 : vector<8x16xf32>
    %65 = arith.truncf %64 : vector<8x16xf32> to vector<8x16xbf16>
    %c0_47 = arith.constant 0 : index
    %c1_48 = arith.constant 1 : index
    %c0_49 = arith.constant 0 : index
    %c0_50 = arith.constant 0 : index
    %66 = vector.load %arg8[%c0_47, %c1_48, %c0_49, %c0_50] : memref<1x4x8x16xbf16, #tpu.memory_space<vmem>>, vector<1x1x8x16xbf16>
    %67 = vector.shape_cast %66 : vector<1x1x8x16xbf16> to vector<8x16xbf16>
    %68 = vector.shape_cast %65 : vector<8x16xbf16> to vector<1x1x8x16xbf16>
    tpu.vector_store %arg8[%c0_47, %c1_48, %c0_49, %c0_50], %68 {strides = array<i32>} : memref<1x4x8x16xbf16, #tpu.memory_space<vmem>>, vector<1x1x8x16xbf16>,
    %69 = arith.truncf %59 : vector<8x16xf32> to vector<8x16xbf16>
    %c0_51 = arith.constant 0 : index
    %c1_52 = arith.constant 1 : index
    %c0_53 = arith.constant 0 : index
    %c0_54 = arith.constant 0 : index
    %70 = vector.load %arg9[%c0_51, %c1_52, %c0_53, %c0_54] : memref<1x4x8x16xbf16, #tpu.memory_space<vmem>>, vector<1x1x8x16xbf16>
    %71 = vector.shape_cast %70 : vector<1x1x8x16xbf16> to vector<8x16xbf16>
    %72 = vector.shape_cast %69 : vector<8x16xbf16> to vector<1x1x8x16xbf16>
    tpu.vector_store %arg9[%c0_51, %c1_52, %c0_53, %c0_54], %72 {strides = array<i32>} : memref<1x4x8x16xbf16, #tpu.memory_space<vmem>>, vector<1x1x8x16xbf16>,
    %73 = arith.truncf %62 : vector<8x16xf32> to vector<8x16xbf16>
    %c0_55 = arith.constant 0 : index
    %c1_56 = arith.constant 1 : index
    %c0_57 = arith.constant 0 : index
    %c0_58 = arith.constant 0 : index
    %74 = vector.load %arg10[%c0_55, %c1_56, %c0_57, %c0_58] : memref<1x4x8x16xbf16, #tpu.memory_space<vmem>>, vector<1x1x8x16xbf16>
    %75 = vector.shape_cast %74 : vector<1x1x8x16xbf16> to vector<8x16xbf16>
    %76 = vector.shape_cast %73 : vector<8x16xbf16> to vector<1x1x8x16xbf16>
    tpu.vector_store %arg10[%c0_55, %c1_56, %c0_57, %c0_58], %76 {strides = array<i32>} : memref<1x4x8x16xbf16, #tpu.memory_space<vmem>>, vector<1x1x8x16xbf16>,
    %c2 = arith.constant 2 : index
    %c0_59 = arith.constant 0 : index
    %c0_60 = arith.constant 0 : index
    %77 = vector.load %arg5[%c2, %c0_59, %c0_60] : memref<4x32x16xbf16, #tpu.memory_space<vmem>>, vector<1x32x16xbf16>
    %78 = vector.shape_cast %77 : vector<1x32x16xbf16> to vector<32x16xbf16>
    %cst_61 = arith.constant dense<0.000000e+00> : vector<8x16xf32>
    %79 = tpu.matmul %30, %78, %cst_61 {dimension_numbers = #tpu.dot_dimension_numbers<[1], [0], [0], [1], [0, 0, 1, 1], [], []>} : vector<8x32xbf16>, vector<32x16xbf16>, vector<8x16xf32> -> vector<8x16xf32>
    %c2_62 = arith.constant 2 : index
    %c0_63 = arith.constant 0 : index
    %c0_64 = arith.constant 0 : index
    %80 = vector.load %arg6[%c2_62, %c0_63, %c0_64] : memref<4x32x16xbf16, #tpu.memory_space<vmem>>, vector<1x32x16xbf16>
    %81 = vector.shape_cast %80 : vector<1x32x16xbf16> to vector<32x16xbf16>
    %cst_65 = arith.constant dense<0.000000e+00> : vector<8x16xf32>
    %82 = tpu.matmul %30, %81, %cst_65 {dimension_numbers = #tpu.dot_dimension_numbers<[1], [0], [0], [1], [0, 0, 1, 1], [], []>} : vector<8x32xbf16>, vector<32x16xbf16>, vector<8x16xf32> -> vector<8x16xf32>
    %c2_66 = arith.constant 2 : index
    %c0_67 = arith.constant 0 : index
    %c0_68 = arith.constant 0 : index
    %83 = vector.load %arg7[%c2_66, %c0_67, %c0_68] : memref<4x32x16xbf16, #tpu.memory_space<vmem>>, vector<1x32x16xbf16>
    %84 = vector.shape_cast %83 : vector<1x32x16xbf16> to vector<32x16xbf16>
    %cst_69 = arith.constant dense<0.000000e+00> : vector<8x16xf32>
    %85 = tpu.matmul %30, %84, %cst_69 {dimension_numbers = #tpu.dot_dimension_numbers<[1], [0], [0], [1], [0, 0, 1, 1], [], []>} : vector<8x32xbf16>, vector<32x16xbf16>, vector<8x16xf32> -> vector<8x16xf32>
    %cst_70 = arith.constant 2.500000e-01 : f32
    %86 = vector.broadcast %cst_70 : f32 to vector<8x16xf32>
    %87 = arith.mulf %79, %86 : vector<8x16xf32>
    %88 = arith.truncf %87 : vector<8x16xf32> to vector<8x16xbf16>
    %c0_71 = arith.constant 0 : index
    %c2_72 = arith.constant 2 : index
    %c0_73 = arith.constant 0 : index
    %c0_74 = arith.constant 0 : index
    %89 = vector.load %arg8[%c0_71, %c2_72, %c0_73, %c0_74] : memref<1x4x8x16xbf16, #tpu.memory_space<vmem>>, vector<1x1x8x16xbf16>
    %90 = vector.shape_cast %89 : vector<1x1x8x16xbf16> to vector<8x16xbf16>
    %91 = vector.shape_cast %88 : vector<8x16xbf16> to vector<1x1x8x16xbf16>
    tpu.vector_store %arg8[%c0_71, %c2_72, %c0_73, %c0_74], %91 {strides = array<i32>} : memref<1x4x8x16xbf16, #tpu.memory_space<vmem>>, vector<1x1x8x16xbf16>,
    %92 = arith.truncf %82 : vector<8x16xf32> to vector<8x16xbf16>
    %c0_75 = arith.constant 0 : index
    %c2_76 = arith.constant 2 : index
    %c0_77 = arith.constant 0 : index
    %c0_78 = arith.constant 0 : index
    %93 = vector.load %arg9[%c0_75, %c2_76, %c0_77, %c0_78] : memref<1x4x8x16xbf16, #tpu.memory_space<vmem>>, vector<1x1x8x16xbf16>
    %94 = vector.shape_cast %93 : vector<1x1x8x16xbf16> to vector<8x16xbf16>
    %95 = vector.shape_cast %92 : vector<8x16xbf16> to vector<1x1x8x16xbf16>
    tpu.vector_store %arg9[%c0_75, %c2_76, %c0_77, %c0_78], %95 {strides = array<i32>} : memref<1x4x8x16xbf16, #tpu.memory_space<vmem>>, vector<1x1x8x16xbf16>,
    %96 = arith.truncf %85 : vector<8x16xf32> to vector<8x16xbf16>
    %c0_79 = arith.constant 0 : index
    %c2_80 = arith.constant 2 : index
    %c0_81 = arith.constant 0 : index
    %c0_82 = arith.constant 0 : index
    %97 = vector.load %arg10[%c0_79, %c2_80, %c0_81, %c0_82] : memref<1x4x8x16xbf16, #tpu.memory_space<vmem>>, vector<1x1x8x16xbf16>
    %98 = vector.shape_cast %97 : vector<1x1x8x16xbf16> to vector<8x16xbf16>
    %99 = vector.shape_cast %96 : vector<8x16xbf16> to vector<1x1x8x16xbf16>
    tpu.vector_store %arg10[%c0_79, %c2_80, %c0_81, %c0_82], %99 {strides = array<i32>} : memref<1x4x8x16xbf16, #tpu.memory_space<vmem>>, vector<1x1x8x16xbf16>,
    %c3 = arith.constant 3 : index
    %c0_83 = arith.constant 0 : index
    %c0_84 = arith.constant 0 : index
    %100 = vector.load %arg5[%c3, %c0_83, %c0_84] : memref<4x32x16xbf16, #tpu.memory_space<vmem>>, vector<1x32x16xbf16>
    %101 = vector.shape_cast %100 : vector<1x32x16xbf16> to vector<32x16xbf16>
    %cst_85 = arith.constant dense<0.000000e+00> : vector<8x16xf32>
    %102 = tpu.matmul %30, %101, %cst_85 {dimension_numbers = #tpu.dot_dimension_numbers<[1], [0], [0], [1], [0, 0, 1, 1], [], []>} : vector<8x32xbf16>, vector<32x16xbf16>, vector<8x16xf32> -> vector<8x16xf32>
    %c3_86 = arith.constant 3 : index
    %c0_87 = arith.constant 0 : index
    %c0_88 = arith.constant 0 : index
    %103 = vector.load %arg6[%c3_86, %c0_87, %c0_88] : memref<4x32x16xbf16, #tpu.memory_space<vmem>>, vector<1x32x16xbf16>
    %104 = vector.shape_cast %103 : vector<1x32x16xbf16> to vector<32x16xbf16>
    %cst_89 = arith.constant dense<0.000000e+00> : vector<8x16xf32>
    %105 = tpu.matmul %30, %104, %cst_89 {dimension_numbers = #tpu.dot_dimension_numbers<[1], [0], [0], [1], [0, 0, 1, 1], [], []>} : vector<8x32xbf16>, vector<32x16xbf16>, vector<8x16xf32> -> vector<8x16xf32>
    %c3_90 = arith.constant 3 : index
    %c0_91 = arith.constant 0 : index
    %c0_92 = arith.constant 0 : index
    %106 = vector.load %arg7[%c3_90, %c0_91, %c0_92] : memref<4x32x16xbf16, #tpu.memory_space<vmem>>, vector<1x32x16xbf16>
    %107 = vector.shape_cast %106 : vector<1x32x16xbf16> to vector<32x16xbf16>
    %cst_93 = arith.constant dense<0.000000e+00> : vector<8x16xf32>
    %108 = tpu.matmul %30, %107, %cst_93 {dimension_numbers = #tpu.dot_dimension_numbers<[1], [0], [0], [1], [0, 0, 1, 1], [], []>} : vector<8x32xbf16>, vector<32x16xbf16>, vector<8x16xf32> -> vector<8x16xf32>
    %cst_94 = arith.constant 2.500000e-01 : f32
    %109 = vector.broadcast %cst_94 : f32 to vector<8x16xf32>
    %110 = arith.mulf %102, %109 : vector<8x16xf32>
    %111 = arith.truncf %110 : vector<8x16xf32> to vector<8x16xbf16>
    %c0_95 = arith.constant 0 : index
    %c3_96 = arith.constant 3 : index
    %c0_97 = arith.constant 0 : index
    %c0_98 = arith.constant 0 : index
    %112 = vector.load %arg8[%c0_95, %c3_96, %c0_97, %c0_98] : memref<1x4x8x16xbf16, #tpu.memory_space<vmem>>, vector<1x1x8x16xbf16>
    %113 = vector.shape_cast %112 : vector<1x1x8x16xbf16> to vector<8x16xbf16>
    %114 = vector.shape_cast %111 : vector<8x16xbf16> to vector<1x1x8x16xbf16>
    tpu.vector_store %arg8[%c0_95, %c3_96, %c0_97, %c0_98], %114 {strides = array<i32>} : memref<1x4x8x16xbf16, #tpu.memory_space<vmem>>, vector<1x1x8x16xbf16>,
    %115 = arith.truncf %105 : vector<8x16xf32> to vector<8x16xbf16>
    %c0_99 = arith.constant 0 : index
    %c3_100 = arith.constant 3 : index
    %c0_101 = arith.constant 0 : index
    %c0_102 = arith.constant 0 : index
    %116 = vector.load %arg9[%c0_99, %c3_100, %c0_101, %c0_102] : memref<1x4x8x16xbf16, #tpu.memory_space<vmem>>, vector<1x1x8x16xbf16>
    %117 = vector.shape_cast %116 : vector<1x1x8x16xbf16> to vector<8x16xbf16>
    %118 = vector.shape_cast %115 : vector<8x16xbf16> to vector<1x1x8x16xbf16>
    tpu.vector_store %arg9[%c0_99, %c3_100, %c0_101, %c0_102], %118 {strides = array<i32>} : memref<1x4x8x16xbf16, #tpu.memory_space<vmem>>, vector<1x1x8x16xbf16>,
    %119 = arith.truncf %108 : vector<8x16xf32> to vector<8x16xbf16>
    %c0_103 = arith.constant 0 : index
    %c3_104 = arith.constant 3 : index
    %c0_105 = arith.constant 0 : index
    %c0_106 = arith.constant 0 : index
    %120 = vector.load %arg10[%c0_103, %c3_104, %c0_105, %c0_106] : memref<1x4x8x16xbf16, #tpu.memory_space<vmem>>, vector<1x1x8x16xbf16>
    %121 = vector.shape_cast %120 : vector<1x1x8x16xbf16> to vector<8x16xbf16>
    %122 = vector.shape_cast %119 : vector<8x16xbf16> to vector<1x1x8x16xbf16>
    tpu.vector_store %arg10[%c0_103, %c3_104, %c0_105, %c0_106], %122 {strides = array<i32>} : memref<1x4x8x16xbf16, #tpu.memory_space<vmem>>, vector<1x1x8x16xbf16>,
    return
  }
  func.func @transform_0(%arg0: i32, %arg1: i32) -> (i32, i32, i32) {
    %c0_i32 = arith.constant 0 : i32
    %c0_i32_0 = arith.constant 0 : i32
    return %arg0, %arg1, %c0_i32 : i32, i32, i32
  }
  func.func @transform_1(%arg0: i32, %arg1: i32) -> (i32, i32) {
    %c0_i32 = arith.constant 0 : i32
    %c0_i32_0 = arith.constant 0 : i32
    %c0_i32_1 = arith.constant 0 : i32
    return %c0_i32, %c0_i32_0 : i32, i32
  }
  func.func @transform_2(%arg0: i32, %arg1: i32) -> (i32, i32) {
    %c0_i32 = arith.constant 0 : i32
    %c0_i32_0 = arith.constant 0 : i32
    %c0_i32_1 = arith.constant 0 : i32
    return %c0_i32, %c0_i32_0 : i32, i32
  }
  func.func @transform_3(%arg0: i32, %arg1: i32) -> (i32, i32, i32) {
    %c0_i32 = arith.constant 0 : i32
    %c0_i32_0 = arith.constant 0 : i32
    %c0_i32_1 = arith.constant 0 : i32
    %c0_i32_2 = arith.constant 0 : i32
    return %c0_i32, %c0_i32_0, %c0_i32_1 : i32, i32, i32
  }
  func.func @transform_4(%arg0: i32, %arg1: i32) -> (i32, i32, i32) {
    %c0_i32 = arith.constant 0 : i32
    %c0_i32_0 = arith.constant 0 : i32
    %c0_i32_1 = arith.constant 0 : i32
    %c0_i32_2 = arith.constant 0 : i32
    return %c0_i32, %c0_i32_0, %c0_i32_1 : i32, i32, i32
  }
  func.func @transform_5(%arg0: i32, %arg1: i32) -> (i32, i32, i32) {
    %c0_i32 = arith.constant 0 : i32
    %c0_i32_0 = arith.constant 0 : i32
    %c0_i32_1 = arith.constant 0 : i32
    %c0_i32_2 = arith.constant 0 : i32
    return %c0_i32, %c0_i32_0, %c0_i32_1 : i32, i32, i32
  }
  func.func @transform_6(%arg0: i32, %arg1: i32) -> (i32, i32, i32, i32) {
    %c0_i32 = arith.constant 0 : i32
    %c0_i32_0 = arith.constant 0 : i32
    %c0_i32_1 = arith.constant 0 : i32
    return %arg0, %c0_i32, %arg1, %c0_i32_0 : i32, i32, i32, i32
  }
  func.func @transform_7(%arg0: i32, %arg1: i32) -> (i32, i32, i32, i32) {
    %c0_i32 = arith.constant 0 : i32
    %c0_i32_0 = arith.constant 0 : i32
    %c0_i32_1 = arith.constant 0 : i32
    return %arg0, %c0_i32, %arg1, %c0_i32_0 : i32, i32, i32, i32
  }
  func.func @transform_8(%arg0: i32, %arg1: i32) -> (i32, i32, i32, i32) {
    %c0_i32 = arith.constant 0 : i32
    %c0_i32_0 = arith.constant 0 : i32
    %c0_i32_1 = arith.constant 0 : i32
    return %arg0, %c0_i32, %arg1, %c0_i32_0 : i32, i32, i32, i32
  }
}

</mosaic_0001>

<bundles_post_ra>
// kernel: tpu_custom_call.1
= control target key start
LH: loop header
LB: loop body
LE: loop exit
PB: predicated region body
PF: predicated region fallthrough
CT: control target
= control target key end

     0   :  { %s2221_s0 = inlined_call_operand.vmem [shape: f32[2,8,32], index: 0, kind: input, shape index: {}]   ;;  %s2222_s1 = inlined_call_operand.vmem [shape: f32[1,32], index: 1, kind: input, shape index: {}]   ;;  %s2223_s2 = inlined_call_operand.vmem [shape: f32[1,32], index: 2, kind: input, shape index: {}]   ;;  %s2224_s3 = inlined_call_operand.vmem [shape: bf16[4,32,16], index: 3, kind: input, shape index: {}]   ;;  %s2225_s4 = inlined_call_operand.vmem [shape: bf16[4,32,16], index: 4, kind: input, shape index: {}]   ;;  %s2226_s5 = inlined_call_operand.vmem [shape: bf16[4,32,16], index: 5, kind: input, shape index: {}]   ;;  %s2227_s6 = inlined_call_operand.hbm [shape: bf16[2,4,8,16], index: 6, kind: output, shape index: {0}]   ;;  %s2228_s7 = inlined_call_operand.hbm [shape: bf16[2,4,8,16], index: 7, kind: output, shape index: {1}]   ;;  %s2229_s8 = inlined_call_operand.hbm [shape: bf16[2,4,8,16], index: 8, kind: output, shape index: {2}]  }
   0x1   :  { %2233 = sst [smem:[#allocation9_spill]] %s2221_s0 }
   0x2   :  { %2234 = sst [smem:[#allocation10_spill]] %s2222_s1 }
   0x3   :  { %2235 = sst [smem:[#allocation11_spill]] %s2223_s2 }
   0x4   :  { %14 = vsyncpa [#allocation3], 0 }
   0x5   :  { %16 = vsyncpa [#allocation3 + $0x1], 0 }
   0x6   :  { %17 = vsyncpa [#allocation5], 0 }
   0x7   :  { %19 = vsyncpa [#allocation5 + $0x1], 0  ;;  %s1828_s27 = smov 0   ;;  %s1830_s28 = smov 0  }
   0x8   :  { %s1832_s29 = smov 0   ;;  %s1834_s30 = smov 0  }
   0x9   :  { %s1836_s9 = smov 0   ;;  %s1838_s10 = smov 0  }
   0xa LB: > { %s1303_s11 = sadd.s32 4294967295, %s1774_s10   ;;  %s2230_s12 = sadd.s32 4294967294, %s1774_s10   ;;  %s1774_s10 = sphi %s1838_s10, %s25_s10   ;;  %s1770_s9 = sphi %s1836_s9, %s2247_s9   ;;  %s1766_s30 = sphi %s1834_s30, %s2246_s30   ;;  %s1762_s29 = sphi %s1832_s29, %s2245_s29   ;;  %s1758_s28 = sphi %s1830_s28, %s2244_s28   ;;  %s1754_s27 = sphi %s1828_s27, %s2243_s27  }
   0xb   : > { %s37_s13 = sadd.s32 1, %s1770_s9  ;;  %s179_s14 = sadd.s32 1, %s1762_s29 }
   0xc   : > { %p39_p0 = scmp.ge.s32.totalorder %s37_s13, 2  ;;  %p189_p1 = scmp.ne.s32.totalorder %s1762_s29, %s1758_s28 }
   0xd   : > { %p190_p2 = scmp.eq.s32.totalorder %s1303_s11, 1  ;;  %p195_p3 = scmp.ne.s32.totalorder %s1758_s28, %s1754_s27 }
   0xe   : > { %s2249_s13 = smov (%p39_p0, %s37_s13), 0  ;;  %p196_p5 = scmp.eq.s32.totalorder %s2230_s12, 1 }
   0xf   : > { %p1870_p4 = por %p190_p2, %p189_p1  ;;  %s174_s16 = ssub.s32 %s1770_s9, %s2249_s13 }
  0x10   : > { %p1307_p6 = scmp.ge.s32.totalorder %s1774_s10, 1  ;;  %p177_p7 = scmp.eq.s32.totalorder %s174_s16, 0 }
  0x11   : > { %p1879_p8 = por %p196_p5, %p195_p3  ;;  %p295_p9 = scmp.lt.s32.totalorder %s1774_s10, 3 }
  0x12   : > { %s1885_s18 = scalar_select %p177_p7, %s1762_s29, %s179_s14  }
  0x13   : > { %p296_p10 = pnand %p1307_p6, %p295_p9 }
  0x14   : > { %p341_p11 = scmp.lt.s32.totalorder (!%p296_p10), %s1766_s30, 1  ;;  %vm352_vm0 = vcmask (!%p296_p10), 261120   ;;  %s2238_s0 = sld [smem:[#allocation9_spill]] (!%p296_p10)  ;;  %v1610_v7 = vld [vmem:[%s2224_s3] sm:$0xff] (!%p296_p10)   ;;  %v1776_v9 = vmov (!%p296_p10), 0.0   ;;  %v1612_v10 = vld [vmem:[%s2224_s3 + $0x8] sm:$0xff] (!%p296_p10)  }
  0x15   : > { %299 = sbr.rel (%p296_p10) target bundleno = 659 (0x293), region = 44  ;;  %v1611_v8 = vld [vmem:[%s2225_s4] sm:$0xff] (!%p296_p10)   ;;  %1445 = vmatprep.subr.bf16.mxu0 (!%p296_p10), %v1776_v9  ;;  %1453 = vmatprep.subr.bf16.mxu1 (!%p296_p10), %v1776_v9  ;;  %v1613_v11 = vld [vmem:[%s2225_s4 + $0x8] sm:$0xff] (!%p296_p10)   ;;  %vm1777_vm1 = vmmov (!%p296_p10), 0   ;;  %s2239_s1 = sld [smem:[#allocation10_spill]] (!%p296_p10)  ;;  %v1615_v22 = vld [vmem:[%s2224_s3 + $0x10] sm:$0xff] (!%p296_p10)  }
  0x16   : > { %1446 = vmatpush3.bf16.msra.mxu0 (!%p296_p10), %v1610_v7  ;;  %1454 = vmatpush3.bf16.msra.mxu1 (!%p296_p10), %v1611_v8  ;;  %s2240_s2 = sld [smem:[#allocation11_spill]] (!%p296_p10)  ;;  %v1614_v21 = vld [vmem:[%s2226_s5] sm:$0xff] (!%p296_p10)   ;;  %v1616_v24 = vld [vmem:[%s2226_s5 + $0x8] sm:$0xff] (!%p296_p10)   ;;  %v1617_v25 = vld [vmem:[%s2224_s3 + $0x18] sm:$0xff] (!%p296_p10)   ;;  %s324_s26 = sand.u32 (!%p296_p10), 1, %s1758_s28   ;;  %vm555_vm2 = vcmask (!%p296_p10), 125952  }
  0x17   : > { %1447 = vmatprep.subr.bf16.mxu0 (!%p296_p10), %v1776_v9  ;;  %1455 = vmatprep.subr.bf16.mxu1 (!%p296_p10), %v1776_v9  ;;  %v1618_v26 = vld [vmem:[%s2225_s4 + $0x10] sm:$0xff] (!%p296_p10)   ;;  %v1620_v28 = vld [vmem:[%s2225_s4 + $0x18] sm:$0xff] (!%p296_p10)   ;;  %v1622_v30 = vld [vmem:[%s2224_s3 + $0x20] sm:$0xff] (!%p296_p10)   ;;  %s1308_s14 = sshll.u32 (!%p296_p10), %s324_s26, 4  ;;  %s2073_s22 = sshll.u32 (!%p296_p10), %s1766_s30, 8 }
  0x18   : > { %1449 = vmatprep.mubr.msk.bf16.mxu0 (!%p296_p10), %vm1777_vm1, %v1776_v9  ;;  %1457 = vmatprep.mubr.msk.bf16.mxu1 (!%p296_p10), %vm1777_vm1, %v1776_v9  ;;  %v1619_v27 = vld [vmem:[%s2226_s5 + $0x10] sm:$0xff] (!%p296_p10)   ;;  %v1621_v29 = vld [vmem:[%s2226_s5 + $0x18] sm:$0xff] (!%p296_p10)   ;;  %v1623_v31 = vld [vmem:[%s2225_s4 + $0x20] sm:$0xff] (!%p296_p10)   ;;  %s2049_s16 = scalar_lea.vmem (!%p296_p10), [#allocation4], %s1308_s14  ;;  %s2083_s24 = scalar_lea.hbm (!%p296_p10), %s2227_s6, %s2073_s22 }
  0x19   : > { %v1624_v32 = vld [vmem:[%s2224_s3 + $0x28] sm:$0xff] (!%p296_p10)   ;;  %v1626_v34 = vld [vmem:[%s2226_s5 + $0x20] sm:$0xff] (!%p296_p10)   ;;  %v1627_v35 = vld [vmem:[%s2224_s3 + $0x30] sm:$0xff] (!%p296_p10)   ;;  %s1146_s25 = sshll.u32 (!%p296_p10), %s2049_s16, 4  ;;  %s2094_s12 = scalar_lea.sflag (!%p296_p10), [#allocation3], %s324_s26  ;;  %s2124_s25 = int_to_ptr.vmem [resolvable:$true] %s1146_s25 }
  0x1a   : > { %1448 = vmatpush3.bf16.msra.mxu0 (!%p296_p10), %v1612_v10  ;;  %1456 = vmatpush3.bf16.msra.mxu1 (!%p296_p10), %v1613_v11  ;;  %v1625_v33 = vld [vmem:[%s2225_s4 + $0x28] sm:$0xff] (!%p296_p10)   ;;  %v1629_v37 = vld [vmem:[%s2224_s3 + $0x38] sm:$0xff] (!%p296_p10)   ;;  %v1630_v38 = vld [vmem:[%s2225_s4 + $0x30] sm:$0xff] (!%p296_p10)  }
  0x1b   : > { %1461 = vmatprep.subr.bf16.mxu0 (!%p296_p10), %v1776_v9  ;;  %1469 = vmatprep.subr.bf16.mxu1 (!%p296_p10), %v1776_v9  ;;  %v1312_v16 = vld [vmem:[%s2239_s1] ss:$0 sm:$0xff] (!%p296_p10)  ;;  %v1628_v36 = vld [vmem:[%s2226_s5 + $0x28] sm:$0xff] (!%p296_p10)   ;;  %v1631_v39 = vld [vmem:[%s2226_s5 + $0x30] sm:$0xff] (!%p296_p10)   ;;  %s1778_s1 = smov (!%p296_p10), [#allocation2]  }
  0x1c   : > { %s342_s19 = scalar_select %p341_p11, %s1766_s30, 1  ;;  %v1313_v18 = vld [vmem:[%s2240_s2] ss:$0 sm:$0xff]  ;;  %v1632_v40 = vld [vmem:[%s2225_s4 + $0x38] sm:$0xff]  }
  0x1d   : > { %v1633_v41 = vld [vmem:[%s2226_s5 + $0x38] sm:$0xff]   ;;  %s1640_s2 = sshll.u32 %s1778_s1, 4  ;;  %s1641_s2 = int_to_ptr.vmem [resolvable:$false] %s1640_s2 }
  0x1e   : > { %s1311_s20 = sshll.u32 %s342_s19, 3  ;;  %s2053_s19 = scalar_lea.vmem [#allocation2], %s1308_s14 }
  0x1f   : > { %s347_s23 = scalar_lea.vmem %s2238_s0, %s1311_s20  ;;  %s2057_s20 = scalar_lea.vmem [#allocation6], %s1308_s14 }
  0x20   : > { %v349_v0 = vld [vmem:[%s347_s23] sm:$0xff]  ;;  %s1129_s21 = sshll.u32 %s2053_s19, 4  ;;  %s2090_s14 = sand.u32 1, %s1303_s11   ;;  %s2075_s21 = int_to_ptr.vmem [resolvable:$true] %s1129_s21 }
  0x21   : > { %v353_v1 = vsel %vm352_vm0, %v349_v0, 0.0  ;;  %s1636_s0 = scalar_lea.vmem %s2075_s21, 256  ;;  %s1642_s30 = scalar_lea.vmem %s1641_s2, 512 }
  0x22   : > { %354 = vadd.xlane.f32.xlu0 %v353_v1  ;;  %p1637_p12 = scmp.ne.s32.totalorder %s2075_s21, %s1636_s0  ;;  %p1643_p1 = scmp.lt.s32.totalorder %s2075_s21, %s1641_s2 }
  0x23   : > { %p1644_p2 = scmp.lt.s32.totalorder %s1642_s30, %s1636_s0 }
  0x24   : > { %p1638_p13 = pnand %p1637_p12, %p1870_p4 }
  0x25   : > { %p1645_p3 = por %p1644_p2, %p1643_p1 }
  0x26   : > { %p1639_p0 = pneg %p1638_p13 }
  0x28   : > { %p1646_p5 = pnand %p1645_p3, %p1639_p0 }
  0xaf   : > { %v355_v2 = vpop.xlane.xlu0 %354 }
  0xb0   : > { %v357_v3 = vmul.f32 0.03125, %v355_v2 }
  0xb2   : > { %v358_v4 = vsub.f32 %v349_v0, %v357_v3 }
  0xb4   : > { %v359_v5 = vmul.f32 %v358_v4, %v358_v4 }
  0xb6   : > { %v360_v6 = vsel %vm352_vm0, %v359_v5, 0.0 }
  0xb7   : > { %361 = vadd.xlane.f32.xlu0 %v360_v6 }
 0x144   : > { %v362_v12 = vpop.xlane.xlu0 %361 }
 0x145   : > { %v363_v13 = vmul.f32 0.03125, %v362_v12 }
 0x147   : > { %v364_v14 = vadd.f32 1e-05, %v363_v13 }
 0x149   : > { %1634 = vrsqrt.f32 %v364_v14 }
 0x153   : > { %v1635_v15 = vpop.eup %1634 }
 0x154   : > { %v366_v17 = vmul.f32 %v1635_v15, %v358_v4 }
 0x156   : > { %v373_v19 = vmul.f32 %v1312_v16, %v366_v17 }
 0x158   : > { %v380_v20 = vadd.f32 %v1313_v18, %v373_v19 }
 0x15a   : > { %v1928_v23 = vpack.c.bf16 %v380_v20, %v380_v20 }
 0x15c   : > { %1450 = vmatmul.mubr.msk.bf16.vlgmr.msra.gmra.mrb[0].mxu0 %vm352_vm0, %v1928_v23  ;;  %1458 = vmatmul.mubr.msk.bf16.vlgmr.msra.gmra.mrb[0].mxu1 %vm352_vm0, %v1928_v23 }
 0x15d   : > { %1462 = vmatpush3.bf16.msra.mxu0 %v1614_v21  ;;  %1470 = vmatpush3.bf16.msra.mxu1 %v1615_v22 }
 0x15e   : > { %1463 = vmatprep.subr.bf16.mxu0 %v1776_v9  ;;  %1471 = vmatprep.subr.bf16.mxu1 %v1776_v9 }
 0x15f   : > { %1465 = vmatprep.mubr.msk.bf16.mxu0 %vm1777_vm1, %v1776_v9  ;;  %1473 = vmatprep.mubr.msk.bf16.mxu1 %vm1777_vm1, %v1776_v9 }
 0x161   : > { %1464 = vmatpush3.bf16.msra.mxu0 %v1616_v24  ;;  %1472 = vmatpush3.bf16.msra.mxu1 %v1617_v25 }
 0x162   : > { %1477 = vmatprep.subr.bf16.mxu0 %v1776_v9  ;;  %1485 = vmatprep.subr.bf16.mxu1 %v1776_v9 }
 0x164   : > { %1466 = vmatmul.mubr.msk.bf16.vlgmr.msra.gmra.mrb[4].mxu0 %vm352_vm0, %v1928_v23  ;;  %1474 = vmatmul.mubr.msk.bf16.vlgmr.msra.gmra.mrb[4].mxu1 %vm352_vm0, %v1928_v23 }
 0x165   : > { %1478 = vmatpush3.bf16.msra.mxu0 %v1618_v26  ;;  %1486 = vmatpush3.bf16.msra.mxu1 %v1619_v27 }
 0x166   : > { %1479 = vmatprep.subr.bf16.mxu0 %v1776_v9  ;;  %1487 = vmatprep.subr.bf16.mxu1 %v1776_v9 }
 0x167   : > { %1481 = vmatprep.mubr.msk.bf16.mxu0 %vm1777_vm1, %v1776_v9  ;;  %1489 = vmatprep.mubr.msk.bf16.mxu1 %vm1777_vm1, %v1776_v9 }
 0x169   : > { %1480 = vmatpush3.bf16.msra.mxu0 %v1620_v28  ;;  %1488 = vmatpush3.bf16.msra.mxu1 %v1621_v29 }
 0x16a   : > { %1493 = vmatprep.subr.bf16.mxu0 %v1776_v9  ;;  %1501 = vmatprep.subr.bf16.mxu1 %v1776_v9 }
 0x16c   : > { %1482 = vmatmul.mubr.msk.bf16.vlgmr.msra.gmra.mrb[8].mxu0 %vm352_vm0, %v1928_v23  ;;  %1490 = vmatmul.mubr.msk.bf16.vlgmr.msra.gmra.mrb[8].mxu1 %vm352_vm0, %v1928_v23 }
 0x16d   : > { %1494 = vmatpush3.bf16.msra.mxu0 %v1622_v30  ;;  %1502 = vmatpush3.bf16.msra.mxu1 %v1623_v31 }
 0x16e   : > { %1495 = vmatprep.subr.bf16.mxu0 %v1776_v9  ;;  %1503 = vmatprep.subr.bf16.mxu1 %v1776_v9 }
 0x16f   : > { %1497 = vmatprep.mubr.msk.bf16.mxu0 %vm1777_vm1, %v1776_v9  ;;  %1505 = vmatprep.mubr.msk.bf16.mxu1 %vm1777_vm1, %v1776_v9 }
 0x171   : > { %1496 = vmatpush3.bf16.msra.mxu0 %v1624_v32  ;;  %1504 = vmatpush3.bf16.msra.mxu1 %v1625_v33 }
 0x172   : > { %1509 = vmatprep.subr.bf16.mxu0 %v1776_v9  ;;  %1517 = vmatprep.subr.bf16.mxu1 %v1776_v9 }
 0x174   : > { %1498 = vmatmul.mubr.msk.bf16.vlgmr.msra.gmra.mrb[12].mxu0 %vm352_vm0, %v1928_v23  ;;  %1506 = vmatmul.mubr.msk.bf16.vlgmr.msra.gmra.mrb[12].mxu1 %vm352_vm0, %v1928_v23 }
 0x175   : > { %1510 = vmatpush3.bf16.msra.mxu0 %v1626_v34  ;;  %1518 = vmatpush3.bf16.msra.mxu1 %v1627_v35 }
 0x176   : > { %1511 = vmatprep.subr.bf16.mxu0 %v1776_v9  ;;  %1519 = vmatprep.subr.bf16.mxu1 %v1776_v9 }
 0x177   : > { %1513 = vmatprep.mubr.msk.bf16.mxu0 %vm1777_vm1, %v1776_v9  ;;  %1521 = vmatprep.mubr.msk.bf16.mxu1 %vm1777_vm1, %v1776_v9 }
 0x179   : > { %1512 = vmatpush3.bf16.msra.mxu0 %v1628_v36  ;;  %1520 = vmatpush3.bf16.msra.mxu1 %v1629_v37 }
 0x17a   : > { %1525 = vmatprep.subr.bf16.mxu0 %v1776_v9  ;;  %1533 = vmatprep.subr.bf16.mxu1 %v1776_v9 }
 0x17c   : > { %1514 = vmatmul.mubr.msk.bf16.vlgmr.msra.gmra.mrb[16].mxu0 %vm352_vm0, %v1928_v23  ;;  %1522 = vmatmul.mubr.msk.bf16.vlgmr.msra.gmra.mrb[16].mxu1 %vm352_vm0, %v1928_v23 }
 0x17d   : > { %1526 = vmatpush3.bf16.msra.mxu0 %v1630_v38  ;;  %1534 = vmatpush3.bf16.msra.mxu1 %v1631_v39 }
 0x17e   : > { %1527 = vmatprep.subr.bf16.mxu0 %v1776_v9  ;;  %1535 = vmatprep.subr.bf16.mxu1 %v1776_v9 }
 0x17f   : > { %1529 = vmatprep.mubr.msk.bf16.mxu0 %vm1777_vm1, %v1776_v9  ;;  %1537 = vmatprep.mubr.msk.bf16.mxu1 %vm1777_vm1, %v1776_v9 }
 0x181   : > { %1528 = vmatpush3.bf16.msra.mxu0 %v1632_v40  ;;  %1536 = vmatpush3.bf16.msra.mxu1 %v1633_v41 }
 0x184   : > { %1530 = vmatmul.mubr.msk.bf16.vlgmr.msra.gmra.mrb[20].mxu0 %vm352_vm0, %v1928_v23  ;;  %1538 = vmatmul.mubr.msk.bf16.vlgmr.msra.gmra.mrb[20].mxu1 %vm352_vm0, %v1928_v23 }
 0x22f   : > { %v435_v42 = vpop.f32.mrb[0].mxu0  ;;  %v491_v43 = vpop.f32.mrb[0].mxu1 }
 0x230   : > { %v553_v44 = vmul.f32 0.25, %v435_v42  ;;  %v557_v45 = vpack.c.bf16 %v491_v43, %v491_v43  ;;  %v1451_v46 = vpop.f32.mrb[1].mxu0  ;;  %v1459_v47 = vpop.f32.mrb[1].mxu1 }
 0x231   : > { %v438_v48 = vpop.f32.mrb[2].mxu0  ;;  %v494_v49 = vpop.f32.mrb[2].mxu1 }
 0x232   : > { %v554_v50 = vpack.c.bf16 %v553_v44, %v553_v44  ;;  %558 = vst.msk [vmem:[%s2049_s16] sm:$0xf] %vm555_vm2, %v557_v45  ;;  %v1452_v51 = vpop.f32.mrb[3].mxu0  ;;  %v1460_v52 = vpop.f32.mrb[3].mxu1 }
 0x234   : > { %556 = vst.msk [vmem:[%s2053_s19] sm:$0xf] %vm555_vm2, %v554_v50 }
 0x237   : > { %v547_v53 = vpop.f32.mrb[4].mxu0  ;;  %v612_v54 = vpop.f32.mrb[4].mxu1 }
 0x238   : > { %v559_v55 = vpack.c.bf16 %v547_v53, %v547_v53  ;;  %v732_v56 = vmul.f32 0.25, %v612_v54  ;;  %v1467_v57 = vpop.f32.mrb[5].mxu0  ;;  %v1475_v58 = vpop.f32.mrb[5].mxu1 }
 0x239   : > { %v550_v59 = vpop.f32.mrb[6].mxu0  ;;  %v615_v60 = vpop.f32.mrb[6].mxu1 }
 0x23a   : > { %560 = vst.msk [vmem:[%s2057_s20] sm:$0xf] %vm555_vm2, %v559_v55  ;;  %v733_v61 = vpack.c.bf16 %v732_v56, %v732_v56  ;;  %v1468_v62 = vpop.f32.mrb[7].mxu0  ;;  %v1476_v63 = vpop.f32.mrb[7].mxu1 }
 0x23c   : > { %1344 = vst.msk [vmem:[%s2053_s19 + $0x4] sm:$0xf] %vm555_vm2, %v733_v61 }
 0x23f   : > { %v669_v0 = vpop.f32.mrb[8].mxu0  ;;  %v726_v1 = vpop.f32.mrb[8].mxu1 }
 0x240   : > { %v736_v2 = vpack.c.bf16 %v669_v0, %v669_v0  ;;  %v739_v3 = vpack.c.bf16 %v726_v1, %v726_v1  ;;  %v1483_v4 = vpop.f32.mrb[9].mxu0  ;;  %v1491_v5 = vpop.f32.mrb[9].mxu1 }
 0x241   : > { %v672_v6 = vpop.f32.mrb[10].mxu0  ;;  %v729_v7 = vpop.f32.mrb[10].mxu1 }
 0x242   : > { %1345 = vst.msk [vmem:[%s2049_s16 + $0x4] sm:$0xf] %vm555_vm2, %v736_v2  ;;  %1346 = vst.msk [vmem:[%s2057_s20 + $0x4] sm:$0xf] %vm555_vm2, %v739_v3  ;;  %v1484_v8 = vpop.f32.mrb[11].mxu0  ;;  %v1492_v9 = vpop.f32.mrb[11].mxu1 }
 0x247   : > { %v793_v10 = vpop.f32.mrb[12].mxu0  ;;  %v850_v11 = vpop.f32.mrb[12].mxu1 }
 0x248   : > { %v913_v12 = vmul.f32 0.25, %v793_v10  ;;  %v917_v13 = vpack.c.bf16 %v850_v11, %v850_v11  ;;  %v1499_v14 = vpop.f32.mrb[13].mxu0  ;;  %v1507_v15 = vpop.f32.mrb[13].mxu1 }
 0x249   : > { %v796_v16 = vpop.f32.mrb[14].mxu0  ;;  %v853_v17 = vpop.f32.mrb[14].mxu1 }
 0x24a   : > { %v914_v18 = vpack.c.bf16 %v913_v12, %v913_v12  ;;  %1369 = vst.msk [vmem:[%s2049_s16 + $0x8] sm:$0xf] %vm555_vm2, %v917_v13  ;;  %v1500_v19 = vpop.f32.mrb[15].mxu0  ;;  %v1508_v20 = vpop.f32.mrb[15].mxu1 }
 0x24c   : > { %1368 = vst.msk [vmem:[%s2053_s19 + $0x8] sm:$0xf] %vm555_vm2, %v914_v18 }
 0x24f   : > { %v907_v21 = vpop.f32.mrb[16].mxu0  ;;  %v974_v22 = vpop.f32.mrb[16].mxu1 }
 0x250   : > { %v920_v23 = vpack.c.bf16 %v907_v21, %v907_v21  ;;  %v1094_v24 = vmul.f32 0.25, %v974_v22  ;;  %v1515_v25 = vpop.f32.mrb[17].mxu0  ;;  %v1523_v26 = vpop.f32.mrb[17].mxu1 }
 0x251   : > { %v910_v27 = vpop.f32.mrb[18].mxu0  ;;  %v977_v28 = vpop.f32.mrb[18].mxu1 }
 0x252   : > { %1370 = vst.msk [vmem:[%s2057_s20 + $0x8] sm:$0xf] %vm555_vm2, %v920_v23  ;;  %v1095_v29 = vpack.c.bf16 %v1094_v24, %v1094_v24  ;;  %v1516_v30 = vpop.f32.mrb[19].mxu0  ;;  %v1524_v31 = vpop.f32.mrb[19].mxu1 }
 0x254   : > { %1392 = vst.msk [vmem:[%s2053_s19 + $0xc] sm:$0xf] %vm555_vm2, %v1095_v29 }
 0x255   : > { %1649 = shalt.err (!%p1646_p5)
}
 0x256   : > { %s1650_s11 = scalar_lea.hbm %s2083_s24, 256  ;;  %s1654_s1 = scalar_lea.hbm %s2227_s6, 512 }
 0x257   : > { %p1651_p6 = scmp.ne.s32.totalorder %s2083_s24, %s1650_s11  ;;  %p1655_p10 = scmp.lt.u32.totalorder %s2083_s24, %s2227_s6 }
 0x258   : > { %p1656_p11 = scmp.lt.u32.totalorder %s1654_s1, %s1650_s11  ;;  %p1658_p13 = scmp.lt.u32.totalorder %s1650_s11, %s2083_s24 }
 0x259   : > { %p1652_p7 = pnand %p1651_p6, %p1870_p4 }
 0x25a   : > { %p1657_p12 = por %p1656_p11, %p1655_p10 }
 0x25b   : > { %p1653_p9 = pneg %p1652_p7 }
 0x25c   : > { %p1659_p0 = por %p1658_p13, %p1657_p12 }
 0x25e   : > { %p1660_p1 = pnand %p1659_p0, %p1653_p9 }
 0x260   : > { %1663 = shalt.err (!%p1660_p1)
}
 0x261   : > { %s2231_s0 = smov 64   ;;  %s1780_s30 = smov 4   ;;  %v1031_v32 = vpop.f32.mrb[20].mxu0  ;;  %v1088_v33 = vpop.f32.mrb[20].mxu1 }
 0x262   : > { %1541 = dma.vmem_to_hbm [thread:$0]  (%p1870_p4), %s2075_s21, 256, %s2083_s24, %s2094_s12, %s2231_s0, %s2231_s0, %s1780_s30   ;;  %v1098_v34 = vpack.c.bf16 %v1031_v32, %v1031_v32  ;;  %v1101_v35 = vpack.c.bf16 %v1088_v33, %v1088_v33  ;;  %v1531_v36 = vpop.f32.mrb[21].mxu0  ;;  %v1539_v37 = vpop.f32.mrb[21].mxu1 }
 0x263   : > { %s1163_s11 = sshll.u32 %s2057_s20, 4  ;;  %s2130_s1 = scalar_lea.hbm %s2228_s7, %s2073_s22  ;;  %v1034_v38 = vpop.f32.mrb[22].mxu0  ;;  %v1091_v39 = vpop.f32.mrb[22].mxu1  ;;  %s2132_s11 = int_to_ptr.vmem [resolvable:$true] %s1163_s11 }
 0x264   : > { %s2138_s24 = scalar_lea.hbm %s2229_s8, %s2073_s22  ;;  %1393 = vst.msk [vmem:[%s2049_s16 + $0xc] sm:$0xf] %vm555_vm2, %v1098_v34  ;;  %1394 = vst.msk [vmem:[%s2057_s20 + $0xc] sm:$0xf] %vm555_vm2, %v1101_v35  ;;  %v1532_v40 = vpop.f32.mrb[23].mxu0  ;;  %v1540_v41 = vpop.f32.mrb[23].mxu1 }
 0x265   : > { %s1110_s23 = scalar_lea.sflag [#allocation5], %s2090_s14  ;;  %s1664_s2 = scalar_lea.vmem %s2124_s25, 256 }
 0x266   : > { %p1665_p2 = scmp.ne.s32.totalorder %s2124_s25, %s1664_s2  ;;  %s1781_s26 = smov [#allocation4]  }
 0x267   : > { %s1668_s19 = sshll.u32 %s1781_s26, 4  ;;  %s1669_s19 = int_to_ptr.vmem [resolvable:$false] %s1668_s19 }
 0x268   : > { %p1666_p3 = pnand %p1665_p2, %p1870_p4  ;;  %s1670_s0 = scalar_lea.vmem %s1669_s19, 512 }
 0x269   : > { %p1671_p6 = scmp.lt.s32.totalorder %s2124_s25, %s1669_s19  ;;  %p1672_p7 = scmp.lt.s32.totalorder %s1670_s0, %s1664_s2 }
 0x26a   : > { %p1667_p5 = pneg %p1666_p3 }
 0x26b   : > { %p1673_p9 = por %p1672_p7, %p1671_p6 }
 0x26d   : > { %p1674_p10 = pnand %p1673_p9, %p1667_p5 }
 0x26f   : > { %1677 = shalt.err (!%p1674_p10)
}
 0x270   : > { %s1678_s16 = scalar_lea.hbm %s2130_s1, 256  ;;  %s1682_s12 = scalar_lea.hbm %s2228_s7, 512 }
 0x271   : > { %p1679_p11 = scmp.ne.s32.totalorder %s2130_s1, %s1678_s16  ;;  %p1683_p0 = scmp.lt.u32.totalorder %s2130_s1, %s2228_s7 }
 0x272   : > { %p1684_p1 = scmp.lt.u32.totalorder %s1682_s12, %s1678_s16  ;;  %p1686_p3 = scmp.lt.u32.totalorder %s1678_s16, %s2130_s1 }
 0x273   : > { %p1680_p12 = pnand %p1679_p11, %p1870_p4 }
 0x274   : > { %p1685_p2 = por %p1684_p1, %p1683_p0 }
 0x275   : > { %p1681_p13 = pneg %p1680_p12 }
 0x276   : > { %p1687_p5 = por %p1686_p3, %p1685_p2 }
 0x278   : > { %p1688_p6 = pnand %p1687_p5, %p1681_p13 }
 0x27a   : > { %1691 = shalt.err (!%p1688_p6)
}
 0x27b   : > { %s2241_s0 = smov 64   ;;  %s1692_s2 = scalar_lea.vmem %s2132_s11, 256 }
 0x27c   : > { %1542 = dma.vmem_to_hbm [thread:$0]  (%p1870_p4), %s2124_s25, 256, %s2130_s1, %s1110_s23, %s2241_s0, %s2241_s0, %s1780_s30  }
 0x27d   : > { %p1693_p7 = scmp.ne.s32.totalorder %s2132_s11, %s1692_s2  ;;  %s1782_s19 = smov [#allocation6]  }
 0x27e   : > { %s1696_s16 = sshll.u32 %s1782_s19, 4  ;;  %s1697_s16 = int_to_ptr.vmem [resolvable:$false] %s1696_s16 }
 0x27f   : > { %p1694_p9 = pnand %p1693_p7, %p1870_p4  ;;  %s1698_s20 = scalar_lea.vmem %s1697_s16, 512 }
 0x280   : > { %p1699_p11 = scmp.lt.s32.totalorder %s2132_s11, %s1697_s16  ;;  %p1700_p12 = scmp.lt.s32.totalorder %s1698_s20, %s1692_s2 }
 0x281   : > { %p1695_p10 = pneg %p1694_p9 }
 0x282   : > { %p1701_p13 = por %p1700_p12, %p1699_p11 }
 0x284   : > { %p1702_p0 = pnand %p1701_p13, %p1695_p10 }
 0x286   : > { %1705 = shalt.err (!%p1702_p0)
}
 0x287   : > { %s1706_s25 = scalar_lea.hbm %s2138_s24, 256  ;;  %s1710_s12 = scalar_lea.hbm %s2229_s8, 512 }
 0x288   : > { %p1707_p1 = scmp.ne.s32.totalorder %s2138_s24, %s1706_s25  ;;  %p1711_p5 = scmp.lt.u32.totalorder %s2138_s24, %s2229_s8 }
 0x289   : > { %p1712_p6 = scmp.lt.u32.totalorder %s1710_s12, %s1706_s25  ;;  %p1714_p9 = scmp.lt.u32.totalorder %s1706_s25, %s2138_s24 }
 0x28a   : > { %p1708_p2 = pnand %p1707_p1, %p1870_p4 }
 0x28b   : > { %p1713_p7 = por %p1712_p6, %p1711_p5 }
 0x28c   : > { %p1709_p3 = pneg %p1708_p2 }
 0x28d   : > { %p1715_p10 = por %p1714_p9, %p1713_p7 }
 0x28f   : > { %p1716_p11 = pnand %p1715_p10, %p1709_p3 }
 0x291   : > { %1719 = shalt.err (!%p1716_p11)
}
 0x292   : > { %1543 = dma.vmem_to_hbm [thread:$0]  (%p1870_p4), %s2132_s11, 256, %s2138_s24, %s1110_s23, %s2241_s0, %s2241_s0, %s1780_s30  }
 0x293 PF: > { %p1557_p12 = scmp.ge.s32.totalorder %s1774_s10, 2  ;;  %s1178_s2 = sand.u32 1, %s1754_s27  }
 0x294   : > { %s1179_s19 = scalar_lea.sflag [#allocation3], %s1178_s2 }
 0x295   : > { %p1548_p13 = pnand %p1557_p12, %p1879_p8 }
 0x297   : > { %1745 = dma.done.wait (!%p1548_p13), %s1179_s19, 256  }
 0x298   : > { %1747 = vsyncadd (!%p1548_p13), %s1179_s19, 4294967040  ;;  %s2242_s15 = sadd.s32 4294967294, %s1774_s10  }
 0x299   : > { %s1187_s16 = sand.u32 1, %s2242_s15  }
 0x29a   : > { %s1188_s20 = scalar_lea.sflag [#allocation5], %s1187_s16 }
 0x29b   : > { %1749 = dma.done.wait (!%p1548_p13), %s1188_s20, 512  }
 0x29c   : > { %1751 = vsyncadd (!%p1548_p13), %s1188_s20, 4294966784  ;;  %s25_s10 = sadd.s32 1, %s1774_s10   ;;  %s2243_s27 = smov %s1758_s28 }
 0x29d   : > { %p22_p4 = scmp.ge.s32.totalorder %s25_s10, 4   ;;  %s2244_s28 = smov %s1762_s29 }
 0x29e   : > { %s2245_s29 = smov %s1885_s18  ;;  %s2246_s30 = smov %s1770_s9 }
 0x29f   : > { %s2247_s9 = smov %s2249_s13  ;;  %24 = sbr.rel (!%p22_p4) target bundleno = 10 (0xa), region = 129 }
 0x2a6   :  { %1202 = vsyncpa [#allocation3], 1 }
 0x2a7   :  { %1204 = vsyncpa [#allocation3 + $0x1], 1 }
 0x2a8   :  { %1205 = vsyncpa [#allocation5], 1 }
 0x2a9   :  { %1207 = vsyncpa [#allocation5 + $0x1], 1 }

</bundles_post_ra>
